<compile_context>
chip_gen: v7x
topology: tpu7x:2x2x1
jax: 0.10.0
libtpu: 0.0.40
codegen_flags: <defaults>
</compile_context>

<pallas_src>
import functools
import math

import jax
import jax.numpy as jnp
from jax.experimental import pallas as pl
from jax.experimental.pallas import tpu as pltpu

_EPS = 1e-5
_LANE = 128
_SUBLANE = 8


def _round_up(v, m):
    return (v + m - 1) // m * m


def _vmem_capacity_bytes():
    try:
        return int(pltpu.get_tpu_info().vmem_capacity_bytes)
    except Exception:
        return 64 * 1024 * 1024  # conservative (v7x per-TC)


def _is_multi_tc_chip():
    try:
        return "7" in jax.devices()[0].device_kind  # TPU7x: 2 TensorCores/chip
    except Exception:
        return False


def _clamp_vmem_limit(ws_bytes, vmem_cap):
    hi = (vmem_cap * 9) // 10
    return int(min(max(ws_bytes + (4 << 20), 16 << 20), hi))


# ----------------------------------------------------------------------------
# Kernels
# ----------------------------------------------------------------------------

def _bn_col_kernel(x_ref, o_ref, *, gamma):
    # x_ref / o_ref: (N, TILE_D). Whole batch column block resident -> 1 pass.
    xf = x_ref[...].astype(jnp.float32)
    inv_n = 1.0 / x_ref.shape[0]
    mean = jnp.sum(xf, axis=0, keepdims=True) * inv_n
    centered = xf - mean
    var = jnp.sum(centered * centered, axis=0, keepdims=True) * inv_n
    scale = jax.lax.rsqrt(var + _EPS) * gamma       # bias frozen at 0 -> no add
    o_ref[...] = (centered * scale).astype(o_ref.dtype)


def _bn_stats_kernel(x_ref, sum_ref, sumsq_ref, *, n_rows):
    # Pass 1 of the large-N path: accumulate per-feature sum / sum of squares.
    # Grid: (d_tiles, n_tiles); n is the trailing "arbitrary" reduction axis.
    k = pl.program_id(1)

    @pl.when(k == 0)
    def _():
        sum_ref[...] = jnp.zeros_like(sum_ref)
        sumsq_ref[...] = jnp.zeros_like(sumsq_ref)

    tile_n = x_ref.shape[0]
    xf = x_ref[...].astype(jnp.float32)
    if n_rows % tile_n != 0:
        # Mask out-of-range rows of the (partial) last batch block.
        rows = jax.lax.broadcasted_iota(jnp.int32, (tile_n, 1), 0) + k * tile_n
        xf = jnp.where(rows < n_rows, xf, 0.0)
    sum_ref[...] += jnp.sum(xf, axis=0, keepdims=True)
    sumsq_ref[...] += jnp.sum(xf * xf, axis=0, keepdims=True)


def _bn_norm_kernel(x_ref, mean_ref, scale_ref, o_ref):
    # Pass 2 of the large-N path: normalize with precomputed mean / scale.
    xf = x_ref[...].astype(jnp.float32)
    o_ref[...] = ((xf - mean_ref[...]) * scale_ref[...]).astype(o_ref.dtype)


# ----------------------------------------------------------------------------
# Wrapper
# ----------------------------------------------------------------------------

def bn_layer_forward(x, gamma, *, force_path=None):
    """BN_Layer.forward: x:(N, dim_z), gamma: scalar BN weight (bias frozen 0)."""
    n, d = x.shape
    itemsize = jnp.dtype(x.dtype).itemsize
    gamma = float(gamma)
    vmem_cap = _vmem_capacity_bytes()

    # ---- Small-input fast path (the real dim_z=32 case): one full-array block.
    if force_path == "fast" or (force_path is None and n * d * itemsize <= (1 << 20)):
        kern = functools.partial(_bn_col_kernel, gamma=gamma)
        return pl.pallas_call(
            kern, out_shape=jax.ShapeDtypeStruct((n, d), x.dtype)
        )(x)

    d_ceil = _round_up(d, _LANE)
    budget = vmem_cap // 4  # per-step working-set budget (generation-aware)

    # Column-resident working set per tile_d lanes:
    #   2 double-buffered blocks (x, out) + ~2 f32 intermediates.
    per_lane_col = 4 * n * itemsize + 2 * n * 4
    max_td = (budget // per_lane_col) // _LANE * _LANE

    use_two_pass = (force_path == "two_pass") or (
        force_path is None and max_td < _LANE)

    if not use_two_pass:
        # ---- Column-resident path: one pass, feature-tiled, batch fully in VMEM.
        tile_d = max(_LANE, min(d_ceil, max_td))
        if _is_multi_tc_chip() and d >= 2 * _LANE and tile_d >= d:
            # Split a single mega-tile so the parallel axis spans both TCs.
            tile_d = max(_LANE, _round_up(pl.cdiv(d, 2), _LANE))
        grid = (pl.cdiv(d, tile_d),)
        ws = 4 * n * tile_d * itemsize + 2 * n * tile_d * 4
        kern = functools.partial(_bn_col_kernel, gamma=gamma)
        return pl.pallas_call(
            kern,
            out_shape=jax.ShapeDtypeStruct((n, d), x.dtype),
            grid=grid,
            in_specs=[pl.BlockSpec((n, tile_d), lambda j: (0, j))],
            out_specs=pl.BlockSpec((n, tile_d), lambda j: (0, j)),
            compiler_params=pltpu.CompilerParams(
                dimension_semantics=("parallel",),
                vmem_limit_bytes=_clamp_vmem_limit(ws, vmem_cap),
            ),
        )(x)

    # ---- Large-N two-pass path: stats reduction over N tiles, then normalize.
    tile_d = min(d_ceil, 512)
    per_row = 4 * tile_d * itemsize + 2 * tile_d * 4
    tile_n = max(_SUBLANE,
                 min(_round_up(n, _SUBLANE),
                     (budget // per_row) // _SUBLANE * _SUBLANE))
    if force_path == "two_pass":
        # Small forced tiles so tests exercise partial blocks on both axes.
        tile_d = min(d_ceil, _LANE)
        tile_n = min(_round_up(n, _SUBLANE), 2 * _SUBLANE)
    grid = (pl.cdiv(d, tile_d), pl.cdiv(n, tile_n))

    # Pass 1: per-feature sum / sum-of-squares (f32 accumulator blocks resident
    # across the trailing "arbitrary" batch axis).
    ws1 = 2 * tile_n * tile_d * itemsize + 2 * tile_n * tile_d * 4 + 8 * tile_d * 4
    stats_kern = functools.partial(_bn_stats_kernel, n_rows=n)
    sums, sumsqs = pl.pallas_call(
        stats_kern,
        out_shape=(jax.ShapeDtypeStruct((1, d), jnp.float32),
                   jax.ShapeDtypeStruct((1, d), jnp.float32)),
        grid=grid,
        in_specs=[pl.BlockSpec((tile_n, tile_d), lambda j, k: (k, j))],
        out_specs=(pl.BlockSpec((1, tile_d), lambda j, k: (0, j)),
                   pl.BlockSpec((1, tile_d), lambda j, k: (0, j))),
        compiler_params=pltpu.CompilerParams(
            dimension_semantics=("parallel", "arbitrary"),
            vmem_limit_bytes=_clamp_vmem_limit(ws1, vmem_cap),
        ),
    )(x)

    # Tiny (1, d) epilogue: mean and fused rsqrt*gamma scale.
    inv_n = 1.0 / n
    mean = sums * inv_n
    var = sumsqs * inv_n - mean * mean
    scale = jax.lax.rsqrt(var + _EPS) * gamma

    # Pass 2: normalize, fully parallel grid.
    ws2 = 4 * tile_n * tile_d * itemsize + 2 * tile_n * tile_d * 4 + 8 * tile_d * 4
    return pl.pallas_call(
        _bn_norm_kernel,
        out_shape=jax.ShapeDtypeStruct((n, d), x.dtype),
        grid=grid,
        in_specs=[pl.BlockSpec((tile_n, tile_d), lambda j, k: (k, j)),
                  pl.BlockSpec((1, tile_d), lambda j, k: (0, j)),
                  pl.BlockSpec((1, tile_d), lambda j, k: (0, j))],
        out_specs=pl.BlockSpec((tile_n, tile_d), lambda j, k: (k, j)),
        compiler_params=pltpu.CompilerParams(
            dimension_semantics=("parallel", "parallel"),
            vmem_limit_bytes=_clamp_vmem_limit(ws2, vmem_cap),
        ),
    )(x, mean, scale)


# ----------------------------------------------------------------------------
# Parameter init (mirrors BN_Layer.__init__; bias frozen at 0, single gamma).
# ----------------------------------------------------------------------------

def bn_gamma(tau=0.5, mu=True, theta=0.5):
    sig = 1.0 / (1.0 + math.exp(-theta))
    if mu:
        return math.sqrt(tau + (1.0 - tau) * sig)          # gamma1
    return math.sqrt((1.0 - tau) * (1.0 - sig))             # gamma2


def _reference_bn(x, gamma):
    xf = x.astype(jnp.float32)
    mean = jnp.mean(xf, axis=0, keepdims=True)
    var = jnp.mean((xf - mean) ** 2, axis=0, keepdims=True)
    return ((xf - mean) / jnp.sqrt(var + _EPS) * gamma).astype(x.dtype)


if __name__ == "__main__":
    # Real BN_Layer use case: (batch, dim_z) = (8, 32) -> fast path.
    dim_z, batch = 32, 8
    x = jax.random.normal(jax.random.PRNGKey(0), (batch, dim_z), dtype=jnp.float32)
    gamma = bn_gamma(tau=0.5, mu=True)

    out = jax.block_until_ready(bn_layer_forward(x, gamma))
    ref = _reference_bn(x, gamma)
    assert out.shape == (batch, dim_z)
    assert out.dtype == x.dtype
    assert jnp.allclose(out, ref, atol=1e-5, rtol=1e-5)

    # Column-resident tiled path (forced; partial last feature block, no padding).
    x2 = jax.random.normal(jax.random.PRNGKey(1), (64, 384), dtype=jnp.float32)
    g2 = bn_gamma(tau=0.5, mu=False)
    out2 = jax.block_until_ready(bn_layer_forward(x2, g2, force_path="column"))
    assert jnp.allclose(out2, _reference_bn(x2, g2), atol=1e-5, rtol=1e-5)

    # Large-N two-pass path (forced; partial tiles on both grid axes).
    x3 = jax.random.normal(jax.random.PRNGKey(2), (40, 200), dtype=jnp.float32)
    out3 = jax.block_until_ready(bn_layer_forward(x3, g2, force_path="two_pass"))
    assert jnp.allclose(out3, _reference_bn(x3, g2), atol=1e-4, rtol=1e-4)

    print("KERNEL_OK")
</pallas_src>

<mosaic_0001>
module attributes {stable_mosaic.version = 11 : i64} {
  func.func @_bn_col_kernel(%arg0: memref<8x32xf32, #tpu.memory_space<vmem>>, %arg1: memref<8x32xf32, #tpu.memory_space<vmem>>) attributes {dimension_semantics = [], scalar_prefetch = 0 : i64, scratch_operands = 0 : i64, tpu.core_type = #tpu.core_type<tc>} {
    %c0 = arith.constant 0 : index
    %c0_0 = arith.constant 0 : index
    %0 = vector.load %arg0[%c0, %c0_0] : memref<8x32xf32, #tpu.memory_space<vmem>>, vector<8x32xf32>
    %cst = arith.constant dense<0.000000e+00> : vector<32xf32>
    %1 = vector.multi_reduction <add>, %0, %cst [0] : vector<8x32xf32> to vector<32xf32>
    %2 = vector.shape_cast %1 : vector<32xf32> to vector<1x32xf32>
    %cst_1 = arith.constant 1.250000e-01 : f32
    %3 = vector.broadcast %cst_1 : f32 to vector<1x32xf32>
    %4 = arith.mulf %2, %3 : vector<1x32xf32>
    %5 = vector.broadcast %4 : vector<1x32xf32> to vector<8x32xf32>
    %6 = arith.subf %0, %5 : vector<8x32xf32>
    %7 = arith.mulf %6, %6 : vector<8x32xf32>
    %cst_2 = arith.constant dense<0.000000e+00> : vector<32xf32>
    %8 = vector.multi_reduction <add>, %7, %cst_2 [0] : vector<8x32xf32> to vector<32xf32>
    %9 = vector.shape_cast %8 : vector<32xf32> to vector<1x32xf32>
    %cst_3 = arith.constant 1.250000e-01 : f32
    %10 = vector.broadcast %cst_3 : f32 to vector<1x32xf32>
    %11 = arith.mulf %9, %10 : vector<1x32xf32>
    %cst_4 = arith.constant 9.99999974E-6 : f32
    %12 = vector.broadcast %cst_4 : f32 to vector<1x32xf32>
    %13 = arith.addf %11, %12 : vector<1x32xf32>
    %14 = math.rsqrt %13 : vector<1x32xf32>
    %cst_5 = arith.constant 0.900682866 : f32
    %15 = vector.broadcast %cst_5 : f32 to vector<1x32xf32>
    %16 = arith.mulf %14, %15 : vector<1x32xf32>
    %17 = vector.broadcast %16 : vector<1x32xf32> to vector<8x32xf32>
    %18 = arith.mulf %6, %17 : vector<8x32xf32>
    %c0_6 = arith.constant 0 : index
    %c0_7 = arith.constant 0 : index
    %19 = vector.load %arg1[%c0_6, %c0_7] : memref<8x32xf32, #tpu.memory_space<vmem>>, vector<8x32xf32>
    tpu.vector_store %arg1[%c0_6, %c0_7], %18 {strides = array<i32>} : memref<8x32xf32, #tpu.memory_space<vmem>>, vector<8x32xf32>,
    return
  }
}

</mosaic_0001>

<bundles_post_ra>
// kernel: tpu_custom_call.1
= control target key start
LH: loop header
LB: loop body
LE: loop exit
PB: predicated region body
PF: predicated region fallthrough
CT: control target
= control target key end

     0   :  { %6 = vsyncpa [#allocation3], 0  ;;  %s152_s0 = inlined_call_operand.hbm [shape: f32[8,32], index: 0, kind: input, shape index: {}]   ;;  %s153_s1 = inlined_call_operand.hbm [shape: f32[8,32], index: 1, kind: output, shape index: {}]  }
   0x1   :  { %7 = vsyncpa [#allocation4], 0  ;;  %s113_s6 = smov [#allocation2]   ;;  %s65_s10 = scalar_lea.hbm %s152_s0, 128 }
   0x2   :  { %s14_s7 = sshll.u32 %s113_s6, 4  ;;  %p66_p0 = scmp.ne.s32.totalorder %s152_s0, %s65_s10  ;;  %s15_s7 = int_to_ptr.vmem [resolvable:$true] %s14_s7 }
   0x3   :  { %p69_p1 = scmp.lt.u32.totalorder %s65_s10, %s152_s0 }
   0x5   :  { %p71_p2 = pnand %p69_p1, %p66_p0 }
   0x7   :  { %74 = shalt.err (!%p71_p2)
}
   0x8   :  { %s75_s15 = scalar_lea.vmem %s15_s7, 128  ;;  %p80_p4 = scmp.lt.s32.totalorder %s15_s7, %s15_s7 }
   0x9   :  { %p76_p3 = scmp.ne.s32.totalorder %s15_s7, %s75_s15  ;;  %p81_p5 = scmp.lt.s32.totalorder %s75_s15, %s75_s15 }
   0xb   :  { %p82_p6 = por %p81_p5, %p80_p4 }
   0xd   :  { %p83_p7 = pnand %p82_p6, %p76_p3 }
   0xf   :  { %86 = shalt.err (!%p83_p7)
}
  0x10   :  { %17 = dma.hbm_to_vmem [thread:$0]  %s152_s0, 128, %s15_s7, [#allocation3]  }
  0x11   :  { %109 = dma.done.wait [#allocation3], 128  }
  0x12   :  { %110 = vsyncadd [#allocation3], 4294967168  ;;  %vm22_vm0 = vcmask 261120   ;;  %v21_v0 = vld [vmem:[#allocation2] sm:$0xff]  ;;  %s114_s0 = smov [#allocation5]  }
  0x13   :  { %v23_v1 = vsel %vm22_vm0, %v21_v0, 0.0  ;;  %s52_s18 = sshll.u32 %s114_s0, 4  ;;  %s53_s18 = int_to_ptr.vmem [resolvable:$true] %s52_s18 }
  0x14   :  { %v24_v2 = vrot.slane %v23_v1, 4  ;;  %s87_s19 = scalar_lea.vmem %s53_s18, 128  ;;  %p92_p9 = scmp.lt.s32.totalorder %s53_s18, %s53_s18 }
  0x15   :  { %p88_p8 = scmp.ne.s32.totalorder %s53_s18, %s87_s19  ;;  %p93_p10 = scmp.lt.s32.totalorder %s87_s19, %s87_s19 }
  0x16   :  { %v25_v3 = vadd.f32 %v24_v2, %v23_v1 }
  0x17   :  { %p94_p11 = por %p93_p10, %p92_p9 }
  0x18   :  { %v26_v4 = vrot.slane %v25_v3, 2 }
  0x19   :  { %p95_p12 = pnand %p94_p11, %p88_p8 }
  0x1a   :  { %v27_v5 = vadd.f32 %v26_v4, %v25_v3 }
  0x1c   :  { %v28_v6 = vrot.slane %v27_v5, 1 }
  0x1e   :  { %v29_v7 = vadd.f32 %v28_v6, %v27_v5 }
  0x20   :  { %v30_v8 = vmul.f32 0.125, %v29_v7 }
  0x22   :  { %v31_v9 = vsub.f32 %v21_v0, %v30_v8 }
  0x24   :  { %v32_v10 = vmul.f32 %v31_v9, %v31_v9 }
  0x26   :  { %v33_v11 = vsel %vm22_vm0, %v32_v10, 0.0 }
  0x27   :  { %v34_v12 = vrot.slane %v33_v11, 4 }
  0x29   :  { %v35_v13 = vadd.f32 %v34_v12, %v33_v11 }
  0x2b   :  { %v36_v14 = vrot.slane %v35_v13, 2 }
  0x2d   :  { %v37_v15 = vadd.f32 %v36_v14, %v35_v13 }
  0x2f   :  { %v38_v16 = vrot.slane %v37_v15, 1 }
  0x31   :  { %v39_v17 = vadd.f32 %v38_v16, %v37_v15 }
  0x33   :  { %v40_v18 = vmul.f32 0.125, %v39_v17 }
  0x35   :  { %v41_v19 = vadd.f32 1e-05, %v40_v18 }
  0x37   :  { %63 = vrsqrt.f32 %v41_v19 }
  0x41   :  { %v64_v20 = vpop.eup %63 }
  0x42   :  { %v43_v21 = vmul.f32 0.90068287, %v64_v20 }
  0x44   :  { %v44_v22 = vmul.f32 %v43_v21, %v31_v9 }
  0x46   :  { %45 = vst.msk [vmem:[#allocation5] sm:$0xff] %vm22_vm0, %v44_v22 }
  0x47   :  { %98 = shalt.err (!%p95_p12)
}
  0x48   :  { %s99_s22 = scalar_lea.hbm %s153_s1, 128 }
  0x49   :  { %p100_p13 = scmp.ne.s32.totalorder %s153_s1, %s99_s22  ;;  %p103_p0 = scmp.lt.u32.totalorder %s99_s22, %s153_s1 }
  0x4b   :  { %p105_p1 = pnand %p103_p0, %p100_p13 }
  0x4d   :  { %108 = shalt.err (!%p105_p1)
}
  0x4e   :  { %55 = dma.vmem_to_hbm [thread:$0]  %s53_s18, 128, %s153_s1, [#allocation4]  }
  0x4f   :  { %111 = dma.done.wait [#allocation4], 128  }
  0x50   :  { %112 = vsyncadd [#allocation4], 4294967168 }
  0x51   :  { %59 = vsyncpa [#allocation3], 1 }
  0x52   :  { %60 = vsyncpa [#allocation4], 1 }

</bundles_post_ra>
